<compile_context>
chip_gen: v5e
topology: v5e:2x2
jax: 0.10.0
libtpu: 0.0.40
codegen_flags: <defaults>
</compile_context>

<pallas_src>
import jax
import jax.numpy as jnp
from jax.experimental import pallas as pl
from jax.experimental.pallas import tpu as pltpu


def _round_up(x, m):
    return ((x + m - 1) // m) * m


def _autoencoder_kernel(x_ref,
                        w1_ref, b1_ref,
                        w2_ref, b2_ref,
                        w3_ref, b3_ref,
                        w4_ref, b4_ref,
                        out_ref):
    # x / weights arrive in bf16; accumulate on the MXU in f32, do the
    # bias-add + ReLU epilogue in f32, downcast only for the next matmul.
    x = x_ref[...]

    h = jnp.dot(x, w1_ref[...], preferred_element_type=jnp.float32) + b1_ref[...]
    h = jnp.maximum(h, 0.0).astype(jnp.bfloat16)

    h = jnp.dot(h, w2_ref[...], preferred_element_type=jnp.float32) + b2_ref[...]
    h = jnp.maximum(h, 0.0).astype(jnp.bfloat16)

    h = jnp.dot(h, w3_ref[...], preferred_element_type=jnp.float32) + b3_ref[...]
    h = jnp.maximum(h, 0.0).astype(jnp.bfloat16)

    h = jnp.dot(h, w4_ref[...], preferred_element_type=jnp.float32) + b4_ref[...]

    out_ref[...] = h.astype(out_ref.dtype)


def autoencoder_forward(x, params, *, compute_dtype=jnp.bfloat16):
    """x: (batch, seq_len, feat). params: (in,out) weights / (1,out) biases (f32)."""
    batch, seq_len, feat = x.shape
    flat_dim = seq_len * feat
    hidden = params["w1"].shape[1]
    half = params["w2"].shape[1]

    # Lane-dense (multiple-of-128) padded widths.
    Dp = _round_up(flat_dim, 128)
    Hp = _round_up(hidden, 128)
    H2p = _round_up(half, 128)

    def pad_w(w, rp, cp):
        r, c = w.shape
        return jnp.pad(w, ((0, rp - r), (0, cp - c))).astype(compute_dtype)

    def pad_b(b, cp):
        return jnp.pad(b, ((0, 0), (0, cp - b.shape[1]))).astype(jnp.float32)

    w1 = pad_w(params["w1"], Dp, Hp)
    b1 = pad_b(params["b1"], Hp)
    w2 = pad_w(params["w2"], Hp, H2p)
    b2 = pad_b(params["b2"], H2p)
    w3 = pad_w(params["w3"], H2p, Hp)
    b3 = pad_b(params["b3"], Hp)
    w4 = pad_w(params["w4"], Hp, Dp)
    b4 = pad_b(params["b4"], Dp)

    # Batch tile: multiple of 8 sublanes; cap at 512 rows (fits v7x 64 MiB VMEM
    # with double-buffered in/out and all intermediates with large headroom).
    TB = 512 if batch >= 512 else _round_up(batch, 8)
    Bp = _round_up(batch, TB)

    x2d = x.reshape(batch, flat_dim)
    x2d = jnp.pad(x2d, ((0, Bp - batch), (0, Dp - flat_dim))).astype(compute_dtype)

    grid = (Bp // TB,)

    # Weights / biases: constant index_map -> resident in VMEM across steps.
    resident = lambda a: pl.BlockSpec(a.shape, lambda i: (0,) * a.ndim)

    cbytes = jnp.dtype(compute_dtype).itemsize
    bytes_per_step = (
        2 * TB * Dp * cbytes                                   # double-buffered x
        + 2 * TB * Dp * 4                                      # double-buffered out (f32)
        + (w1.size + w2.size + w3.size + w4.size) * cbytes     # resident weights
        + (b1.size + b2.size + b3.size + b4.size) * 4          # resident biases
        + 4 * TB * max(Dp, Hp, H2p) * 4                        # live f32 intermediates
    )
    vmem_limit = int(min(max(2 * bytes_per_step, 16 * 1024 * 1024), 64 * 1024 * 1024))

    out2d = pl.pallas_call(
        _autoencoder_kernel,
        out_shape=jax.ShapeDtypeStruct((Bp, Dp), x.dtype),
        grid=grid,
        in_specs=[pl.BlockSpec((TB, Dp), lambda i: (i, 0)),
                  resident(w1), resident(b1),
                  resident(w2), resident(b2),
                  resident(w3), resident(b3),
                  resident(w4), resident(b4)],
        out_specs=pl.BlockSpec((TB, Dp), lambda i: (i, 0)),
        compiler_params=pltpu.CompilerParams(
            dimension_semantics=("parallel",),
            vmem_limit_bytes=vmem_limit),
    )(x2d, w1, b1, w2, b2, w3, b3, w4, b4)

    out2d = out2d[:batch, :flat_dim].astype(x.dtype)
    return out2d.reshape(batch, seq_len, feat)


def reference_forward(x, params):
    """Pure-JAX f32 reference matching the PyTorch module."""
    b, s, f = x.shape
    h = x.reshape(b, -1)
    h = jnp.maximum(h @ params["w1"] + params["b1"], 0.0)
    h = jnp.maximum(h @ params["w2"] + params["b2"], 0.0)
    h = jnp.maximum(h @ params["w3"] + params["b3"], 0.0)
    h = h @ params["w4"] + params["b4"]
    return h.reshape(b, s, f)


def init_params(key, input_dim, hidden_dim=64):
    """Deterministic synthetic init; weights stored as (in_features, out_features)."""
    dims = [(input_dim, hidden_dim),
            (hidden_dim, hidden_dim // 2),
            (hidden_dim // 2, hidden_dim),
            (hidden_dim, input_dim)]
    params = {}
    keys = jax.random.split(key, 2 * len(dims))
    for i, (din, dout) in enumerate(dims):
        bound = 1.0 / jnp.sqrt(din)  # mimic PyTorch Linear default uniform bound
        w = jax.random.uniform(keys[2 * i], (din, dout), jnp.float32, -bound, bound)
        b = jax.random.uniform(keys[2 * i + 1], (1, dout), jnp.float32, -bound, bound)
        params[f"w{i + 1}"] = w
        params[f"b{i + 1}"] = b
    return params


if __name__ == "__main__":
    # Small shapes consistent with the module: (B, S, D) flattened to input_dim = S*D.
    batch, seq_len, feat = 2, 8, 4
    input_dim = seq_len * feat        # 32 — matches nn.Linear(input_dim, hidden_dim)
    hidden_dim = 64

    key = jax.random.PRNGKey(0)
    k_x, k_p = jax.random.split(key)
    x = jax.random.normal(k_x, (batch, seq_len, feat), jnp.float32)
    params = init_params(k_p, input_dim, hidden_dim)

    out = autoencoder_forward(x, params)
    jax.block_until_ready(out)
    assert out.shape == (batch, seq_len, feat)

    ref = reference_forward(x, params)
    max_err = float(jnp.max(jnp.abs(out - ref)))
    # bf16 matmul inputs / f32 accumulation -> loose tolerance vs the f32 reference.
    assert max_err < 1e-1, f"max abs error {max_err}"
    print("KERNEL_OK")
</pallas_src>

<mosaic_0001>
module attributes {stable_mosaic.version = 11 : i64} {
  func.func @_autoencoder_kernel(%arg0: i32, %arg1: memref<8x128xbf16, #tpu.memory_space<vmem>>, %arg2: memref<128x128xbf16, #tpu.memory_space<vmem>>, %arg3: memref<1x128xf32, #tpu.memory_space<vmem>>, %arg4: memref<128x128xbf16, #tpu.memory_space<vmem>>, %arg5: memref<1x128xf32, #tpu.memory_space<vmem>>, %arg6: memref<128x128xbf16, #tpu.memory_space<vmem>>, %arg7: memref<1x128xf32, #tpu.memory_space<vmem>>, %arg8: memref<128x128xbf16, #tpu.memory_space<vmem>>, %arg9: memref<1x128xf32, #tpu.memory_space<vmem>>, %arg10: memref<8x128xf32, #tpu.memory_space<vmem>>) attributes {dimension_semantics = [#tpu.dimension_semantics<parallel>], iteration_bounds = array<i64: 1>, scalar_prefetch = 0 : i64, scratch_operands = 0 : i64, tpu.core_type = #tpu.core_type<tc>, window_params = [{transform_indices = @transform_0, window_bounds = array<i64: 8, 128>}, {pipeline_mode = #tpu.pipeline_mode<synchronous>, transform_indices = @transform_1, window_bounds = array<i64: 128, 128>}, {pipeline_mode = #tpu.pipeline_mode<synchronous>, transform_indices = @transform_2, window_bounds = array<i64: 1, 128>}, {pipeline_mode = #tpu.pipeline_mode<synchronous>, transform_indices = @transform_3, window_bounds = array<i64: 128, 128>}, {pipeline_mode = #tpu.pipeline_mode<synchronous>, transform_indices = @transform_4, window_bounds = array<i64: 1, 128>}, {pipeline_mode = #tpu.pipeline_mode<synchronous>, transform_indices = @transform_5, window_bounds = array<i64: 128, 128>}, {pipeline_mode = #tpu.pipeline_mode<synchronous>, transform_indices = @transform_6, window_bounds = array<i64: 1, 128>}, {pipeline_mode = #tpu.pipeline_mode<synchronous>, transform_indices = @transform_7, window_bounds = array<i64: 128, 128>}, {pipeline_mode = #tpu.pipeline_mode<synchronous>, transform_indices = @transform_8, window_bounds = array<i64: 1, 128>}, {transform_indices = @transform_9, window_bounds = array<i64: 8, 128>}]} {
    %c0 = arith.constant 0 : index
    %c0_0 = arith.constant 0 : index
    %0 = vector.load %arg1[%c0, %c0_0] : memref<8x128xbf16, #tpu.memory_space<vmem>>, vector<8x128xbf16>
    %c0_1 = arith.constant 0 : index
    %c0_2 = arith.constant 0 : index
    %1 = vector.load %arg2[%c0_1, %c0_2] : memref<128x128xbf16, #tpu.memory_space<vmem>>, vector<128x128xbf16>
    %cst = arith.constant dense<0.000000e+00> : vector<8x128xf32>
    %2 = tpu.matmul %0, %1, %cst {dimension_numbers = #tpu.dot_dimension_numbers<[1], [0], [0], [1], [0, 0, 1, 1], [], []>} : vector<8x128xbf16>, vector<128x128xbf16>, vector<8x128xf32> -> vector<8x128xf32>
    %c0_3 = arith.constant 0 : index
    %c0_4 = arith.constant 0 : index
    %3 = vector.load %arg3[%c0_3, %c0_4] : memref<1x128xf32, #tpu.memory_space<vmem>>, vector<1x128xf32>
    %4 = vector.broadcast %3 : vector<1x128xf32> to vector<8x128xf32>
    %5 = arith.addf %2, %4 : vector<8x128xf32>
    %cst_5 = arith.constant 0.000000e+00 : f32
    %6 = vector.broadcast %cst_5 : f32 to vector<8x128xf32>
    %7 = arith.maximumf %5, %6 : vector<8x128xf32>
    %8 = arith.truncf %7 : vector<8x128xf32> to vector<8x128xbf16>
    %c0_6 = arith.constant 0 : index
    %c0_7 = arith.constant 0 : index
    %9 = vector.load %arg4[%c0_6, %c0_7] : memref<128x128xbf16, #tpu.memory_space<vmem>>, vector<128x128xbf16>
    %cst_8 = arith.constant dense<0.000000e+00> : vector<8x128xf32>
    %10 = tpu.matmul %8, %9, %cst_8 {dimension_numbers = #tpu.dot_dimension_numbers<[1], [0], [0], [1], [0, 0, 1, 1], [], []>} : vector<8x128xbf16>, vector<128x128xbf16>, vector<8x128xf32> -> vector<8x128xf32>
    %c0_9 = arith.constant 0 : index
    %c0_10 = arith.constant 0 : index
    %11 = vector.load %arg5[%c0_9, %c0_10] : memref<1x128xf32, #tpu.memory_space<vmem>>, vector<1x128xf32>
    %12 = vector.broadcast %11 : vector<1x128xf32> to vector<8x128xf32>
    %13 = arith.addf %10, %12 : vector<8x128xf32>
    %cst_11 = arith.constant 0.000000e+00 : f32
    %14 = vector.broadcast %cst_11 : f32 to vector<8x128xf32>
    %15 = arith.maximumf %13, %14 : vector<8x128xf32>
    %16 = arith.truncf %15 : vector<8x128xf32> to vector<8x128xbf16>
    %c0_12 = arith.constant 0 : index
    %c0_13 = arith.constant 0 : index
    %17 = vector.load %arg6[%c0_12, %c0_13] : memref<128x128xbf16, #tpu.memory_space<vmem>>, vector<128x128xbf16>
    %cst_14 = arith.constant dense<0.000000e+00> : vector<8x128xf32>
    %18 = tpu.matmul %16, %17, %cst_14 {dimension_numbers = #tpu.dot_dimension_numbers<[1], [0], [0], [1], [0, 0, 1, 1], [], []>} : vector<8x128xbf16>, vector<128x128xbf16>, vector<8x128xf32> -> vector<8x128xf32>
    %c0_15 = arith.constant 0 : index
    %c0_16 = arith.constant 0 : index
    %19 = vector.load %arg7[%c0_15, %c0_16] : memref<1x128xf32, #tpu.memory_space<vmem>>, vector<1x128xf32>
    %20 = vector.broadcast %19 : vector<1x128xf32> to vector<8x128xf32>
    %21 = arith.addf %18, %20 : vector<8x128xf32>
    %cst_17 = arith.constant 0.000000e+00 : f32
    %22 = vector.broadcast %cst_17 : f32 to vector<8x128xf32>
    %23 = arith.maximumf %21, %22 : vector<8x128xf32>
    %24 = arith.truncf %23 : vector<8x128xf32> to vector<8x128xbf16>
    %c0_18 = arith.constant 0 : index
    %c0_19 = arith.constant 0 : index
    %25 = vector.load %arg8[%c0_18, %c0_19] : memref<128x128xbf16, #tpu.memory_space<vmem>>, vector<128x128xbf16>
    %cst_20 = arith.constant dense<0.000000e+00> : vector<8x128xf32>
    %26 = tpu.matmul %24, %25, %cst_20 {dimension_numbers = #tpu.dot_dimension_numbers<[1], [0], [0], [1], [0, 0, 1, 1], [], []>} : vector<8x128xbf16>, vector<128x128xbf16>, vector<8x128xf32> -> vector<8x128xf32>
    %c0_21 = arith.constant 0 : index
    %c0_22 = arith.constant 0 : index
    %27 = vector.load %arg9[%c0_21, %c0_22] : memref<1x128xf32, #tpu.memory_space<vmem>>, vector<1x128xf32>
    %28 = vector.broadcast %27 : vector<1x128xf32> to vector<8x128xf32>
    %29 = arith.addf %26, %28 : vector<8x128xf32>
    %c0_23 = arith.constant 0 : index
    %c0_24 = arith.constant 0 : index
    %30 = vector.load %arg10[%c0_23, %c0_24] : memref<8x128xf32, #tpu.memory_space<vmem>>, vector<8x128xf32>
    tpu.vector_store %arg10[%c0_23, %c0_24], %29 {strides = array<i32>} : memref<8x128xf32, #tpu.memory_space<vmem>>, vector<8x128xf32>,
    return
  }
  func.func @transform_0(%arg0: i32) -> (i32, i32) {
    %c0_i32 = arith.constant 0 : i32
    %c0_i32_0 = arith.constant 0 : i32
    return %arg0, %c0_i32 : i32, i32
  }
  func.func @transform_1(%arg0: i32) -> (i32, i32) {
    %c0_i32 = arith.constant 0 : i32
    %c0_i32_0 = arith.constant 0 : i32
    %c0_i32_1 = arith.constant 0 : i32
    return %c0_i32, %c0_i32_0 : i32, i32
  }
  func.func @transform_2(%arg0: i32) -> (i32, i32) {
    %c0_i32 = arith.constant 0 : i32
    %c0_i32_0 = arith.constant 0 : i32
    %c0_i32_1 = arith.constant 0 : i32
    return %c0_i32, %c0_i32_0 : i32, i32
  }
  func.func @transform_3(%arg0: i32) -> (i32, i32) {
    %c0_i32 = arith.constant 0 : i32
    %c0_i32_0 = arith.constant 0 : i32
    %c0_i32_1 = arith.constant 0 : i32
    return %c0_i32, %c0_i32_0 : i32, i32
  }
  func.func @transform_4(%arg0: i32) -> (i32, i32) {
    %c0_i32 = arith.constant 0 : i32
    %c0_i32_0 = arith.constant 0 : i32
    %c0_i32_1 = arith.constant 0 : i32
    return %c0_i32, %c0_i32_0 : i32, i32
  }
  func.func @transform_5(%arg0: i32) -> (i32, i32) {
    %c0_i32 = arith.constant 0 : i32
    %c0_i32_0 = arith.constant 0 : i32
    %c0_i32_1 = arith.constant 0 : i32
    return %c0_i32, %c0_i32_0 : i32, i32
  }
  func.func @transform_6(%arg0: i32) -> (i32, i32) {
    %c0_i32 = arith.constant 0 : i32
    %c0_i32_0 = arith.constant 0 : i32
    %c0_i32_1 = arith.constant 0 : i32
    return %c0_i32, %c0_i32_0 : i32, i32
  }
  func.func @transform_7(%arg0: i32) -> (i32, i32) {
    %c0_i32 = arith.constant 0 : i32
    %c0_i32_0 = arith.constant 0 : i32
    %c0_i32_1 = arith.constant 0 : i32
    return %c0_i32, %c0_i32_0 : i32, i32
  }
  func.func @transform_8(%arg0: i32) -> (i32, i32) {
    %c0_i32 = arith.constant 0 : i32
    %c0_i32_0 = arith.constant 0 : i32
    %c0_i32_1 = arith.constant 0 : i32
    return %c0_i32, %c0_i32_0 : i32, i32
  }
  func.func @transform_9(%arg0: i32) -> (i32, i32) {
    %c0_i32 = arith.constant 0 : i32
    %c0_i32_0 = arith.constant 0 : i32
    return %arg0, %c0_i32 : i32, i32
  }
}

</mosaic_0001>

<bundles_post_ra>
// kernel: tpu_custom_call.1
= control target key start
LH: loop header
LB: loop body
LE: loop exit
PB: predicated region body
PF: predicated region fallthrough
CT: control target
= control target key end

     0   :  { %14 = vsyncpa [#allocation3], 0  ;;  %s872_s0 = inlined_call_operand.hbm [shape: bf16[8,128], index: 0, kind: input, shape index: {}]   ;;  %s873_s1 = inlined_call_operand.hbm [shape: bf16[128,128], index: 1, kind: input, shape index: {}]   ;;  %s874_s2 = inlined_call_operand.vmem [shape: f32[1,128], index: 2, kind: input, shape index: {}]   ;;  %s875_s3 = inlined_call_operand.hbm [shape: bf16[128,128], index: 3, kind: input, shape index: {}]   ;;  %s876_s4 = inlined_call_operand.vmem [shape: f32[1,128], index: 4, kind: input, shape index: {}]   ;;  %s877_s5 = inlined_call_operand.hbm [shape: bf16[128,128], index: 5, kind: input, shape index: {}]   ;;  %s878_s6 = inlined_call_operand.vmem [shape: f32[1,128], index: 6, kind: input, shape index: {}]   ;;  %s879_s7 = inlined_call_operand.hbm [shape: bf16[128,128], index: 7, kind: input, shape index: {}]   ;;  %s880_s8 = inlined_call_operand.vmem [shape: f32[1,128], index: 8, kind: input, shape index: {}]   ;;  %s881_s9 = inlined_call_operand.hbm [shape: f32[8,128], index: 9, kind: output, shape index: {}]  }
   0x1   :  { %15 = vsyncpa [#allocation6], 0 }
   0x2   :  { %16 = vsyncpa [#allocation9], 0  ;;  %s33_s11 = sshll.u32 %s873_s1, 4  ;;  %s34_s11 = int_to_ptr.hbm [resolvable:$true] %s33_s11 }
   0x3   :  { %17 = vsyncpa [#allocation4], 0  ;;  %s784_s12 = smov [#allocation5]   ;;  %s63_s16 = sshll.u32 %s877_s5, 4  ;;  %s64_s16 = int_to_ptr.hbm [resolvable:$true] %s63_s16 }
   0x4   :  { %s35_s13 = sshll.u32 %s784_s12, 4  ;;  %s785_s17 = smov 64   ;;  %s36_s13 = int_to_ptr.vmem [resolvable:$true] %s35_s13 }
   0x5   :  { %s786_s18 = smov 4   ;;  %s787_s19 = smov [#allocation8]  }
   0x6   :  { %41 = dma.hbm_to_vmem [thread:$0]  %s34_s11, 1024, %s36_s13, [#allocation6], %s785_s17, %s785_s17, %s786_s18  }
   0x7   :  { %s65_s20 = sshll.u32 %s787_s19, 4  ;;  %s23_s23 = sshll.u32 %s872_s0, 4  ;;  %s66_s20 = int_to_ptr.vmem [resolvable:$true] %s65_s20  ;;  %s24_s23 = int_to_ptr.hbm [resolvable:$true] %s23_s23 }
   0x8   :  { %71 = dma.hbm_to_vmem [thread:$0]  %s64_s16, 1024, %s66_s20, [#allocation9], %s785_s17, %s785_s17, %s786_s18  }
   0x9   :  { %s48_s25 = sshll.u32 %s875_s3, 4  ;;  %s788_s26 = smov [#allocation2]   ;;  %s49_s25 = int_to_ptr.hbm [resolvable:$true] %s48_s25 }
   0xa   :  { %s25_s27 = sshll.u32 %s788_s26, 4  ;;  %s789_s5 = smov [#allocation7]   ;;  %s26_s27 = int_to_ptr.vmem [resolvable:$true] %s25_s27 }
   0xb   :  { %28 = dma.hbm_to_vmem [thread:$0]  %s24_s23, 64, %s26_s27, [#allocation3]  }
   0xc   :  { %s50_s28 = sshll.u32 %s789_s5, 4  ;;  %s78_s10 = sshll.u32 %s879_s7, 4  ;;  %s51_s28 = int_to_ptr.vmem [resolvable:$true] %s50_s28  ;;  %s79_s10 = int_to_ptr.hbm [resolvable:$true] %s78_s10 }
   0xd   :  { %56 = dma.hbm_to_vmem [thread:$0]  %s49_s25, 1024, %s51_s28, [#allocation6], %s785_s17, %s785_s17, %s786_s18  }
   0xe   :  { %s790_s0 = smov [#allocation10]  }
   0xf   :  { %s80_s11 = sshll.u32 %s790_s0, 4  ;;  %s81_s11 = int_to_ptr.vmem [resolvable:$true] %s80_s11 }
  0x10   :  { %86 = dma.hbm_to_vmem [thread:$0]  %s79_s10, 1024, %s81_s11, [#allocation9], %s785_s17, %s785_s17, %s786_s18  }
  0x11   :  { %776 = dma.done.wait [#allocation3], 64  }
  0x12   :  { %777 = vsyncadd [#allocation3], 4294967232 }
  0x13   :  { %778 = dma.done.wait [#allocation6], 2048  }
  0x14   :  { %779 = vsyncadd [#allocation6], 4294965248 }
  0x15   :  { %780 = dma.done.wait [#allocation9], 2048  }
  0x16   :  { %781 = vsyncadd [#allocation9], 4294965248  ;;  %v595_v0 = vld [vmem:[#allocation5 + $0x38] sm:$0xff]  ;;  %v594_v1 = vld [vmem:[#allocation5 + $0x30] sm:$0xff]  ;;  %s791_s16 = smov [#allocation11]   ;;  %s448_s20 = sshll.u32 %s881_s9, 4  ;;  %s449_s20 = int_to_ptr.hbm [resolvable:$true] %s448_s20 }
  0x17   :  { %178 = vmatpush.bf16.msra.mxu0 %v595_v0  ;;  %v603_v2 = vld [vmem:[#allocation7 + $0x38] sm:$0xff]  ;;  %v602_v3 = vld [vmem:[#allocation7 + $0x30] sm:$0xff]  ;;  %v593_v4 = vld [vmem:[#allocation5 + $0x28] sm:$0xff]  ;;  %s446_s17 = sshll.u32 %s791_s16, 4  ;;  %s447_s17 = int_to_ptr.vmem [resolvable:$true] %s446_s17 }
  0x18   :  { %261 = vmatpush.bf16.msra.mxu1 %v603_v2  ;;  %v601_v5 = vld [vmem:[#allocation7 + $0x28] sm:$0xff]  ;;  %v592_v6 = vld [vmem:[#allocation5 + $0x20] sm:$0xff]  ;;  %v591_v8 = vld [vmem:[#allocation5 + $0x18] sm:$0xff] }
  0x19   :  { %v600_v7 = vld [vmem:[#allocation7 + $0x20] sm:$0xff]  ;;  %v599_v9 = vld [vmem:[#allocation7 + $0x18] sm:$0xff]  ;;  %v590_v10 = vld [vmem:[#allocation5 + $0x10] sm:$0xff] }
  0x1a   :  { %v598_v11 = vld [vmem:[#allocation7 + $0x10] sm:$0xff]  ;;  %v589_v12 = vld [vmem:[#allocation5 + $0x8] sm:$0xff]  ;;  %v588_v13 = vld [vmem:[#allocation5] sm:$0xff] }
  0x1b   :  { %179 = vmatpush.bf16.msra.mxu0 %v594_v1  ;;  %v109_v14 = vld [vmem:[#allocation2] sm:$0xf]  ;;  %v597_v15 = vld [vmem:[#allocation7 + $0x8] sm:$0xff]  ;;  %v596_v16 = vld [vmem:[#allocation7] sm:$0xff] }
  0x1c   :  { %262 = vmatpush.bf16.msra.mxu1 %v602_v3  ;;  %v611_v17 = vld [vmem:[#allocation8 + $0x38] sm:$0xff]  ;;  %v610_v18 = vld [vmem:[#allocation8 + $0x30] sm:$0xff]  ;;  %v609_v19 = vld [vmem:[#allocation8 + $0x28] sm:$0xff] }
  0x1d   :  { %344 = vmatpush.bf16.msra.mxu2 %v611_v17  ;;  %v608_v20 = vld [vmem:[#allocation8 + $0x20] sm:$0xff]  ;;  %v607_v21 = vld [vmem:[#allocation8 + $0x18] sm:$0xff]  ;;  %v606_v22 = vld [vmem:[#allocation8 + $0x10] sm:$0xff] }
  0x1e   :  { %v628_v23 = vld [vmem:[%s874_s2] ss:$0 sm:$0xff]  ;;  %v605_v29 = vld [vmem:[#allocation8 + $0x8] sm:$0xff]  ;;  %v604_v30 = vld [vmem:[#allocation8] sm:$0xff] }
  0x1f   :  { %180 = vmatpush.bf16.msra.mxu0 %v593_v4  ;;  %v619_v31 = vld [vmem:[#allocation10 + $0x38] sm:$0xff]  ;;  %v618_v32 = vld [vmem:[#allocation10 + $0x30] sm:$0xff]  ;;  %v617_v33 = vld [vmem:[#allocation10 + $0x28] sm:$0xff] }
  0x20   :  { %263 = vmatpush.bf16.msra.mxu1 %v601_v5  ;;  %427 = vmatpush.bf16.msra.mxu3 %v619_v31  ;;  %v616_v34 = vld [vmem:[#allocation10 + $0x20] sm:$0xff]  ;;  %v615_v35 = vld [vmem:[#allocation10 + $0x18] sm:$0xff]  ;;  %v614_v36 = vld [vmem:[#allocation10 + $0x10] sm:$0xff] }
  0x21   :  { %345 = vmatpush.bf16.msra.mxu2 %v610_v18  ;;  %v629_v37 = vld [vmem:[%s876_s4] ss:$0 sm:$0xff]  ;;  %v613_v43 = vld [vmem:[#allocation10 + $0x8] sm:$0xff]  ;;  %v612_v44 = vld [vmem:[#allocation10] sm:$0xff] }
  0x22   :  { %v630_v45 = vld [vmem:[%s878_s6] ss:$0 sm:$0xff] }
  0x23   :  { %181 = vmatpush.bf16.msra.mxu0 %v592_v6  ;;  %v631_v51 = vld [vmem:[%s880_s8] ss:$0 sm:$0xff] }
  0x24   :  { %264 = vmatpush.bf16.msra.mxu1 %v600_v7  ;;  %428 = vmatpush.bf16.msra.mxu3 %v618_v32 }
  0x25   :  { %346 = vmatpush.bf16.msra.mxu2 %v609_v19 }
  0x27   :  { %182 = vmatpush.bf16.msra.mxu0 %v591_v8 }
  0x28   :  { %265 = vmatpush.bf16.msra.mxu1 %v599_v9  ;;  %429 = vmatpush.bf16.msra.mxu3 %v617_v33 }
  0x29   :  { %347 = vmatpush.bf16.msra.mxu2 %v608_v20 }
  0x2b   :  { %183 = vmatpush.bf16.msra.mxu0 %v590_v10 }
  0x2c   :  { %266 = vmatpush.bf16.msra.mxu1 %v598_v11  ;;  %430 = vmatpush.bf16.msra.mxu3 %v616_v34 }
  0x2d   :  { %348 = vmatpush.bf16.msra.mxu2 %v607_v21 }
  0x2f   :  { %184 = vmatpush.bf16.msra.mxu0 %v589_v12 }
  0x30   :  { %267 = vmatpush.bf16.msra.mxu1 %v597_v15  ;;  %431 = vmatpush.bf16.msra.mxu3 %v615_v35 }
  0x31   :  { %349 = vmatpush.bf16.msra.mxu2 %v606_v22 }
  0x33   :  { %185 = vmatpush.bf16.msra.mxu0 %v588_v13 }
  0x34   :  { %268 = vmatpush.bf16.msra.mxu1 %v596_v16  ;;  %432 = vmatpush.bf16.msra.mxu3 %v614_v36 }
  0x35   :  { %350 = vmatpush.bf16.msra.mxu2 %v605_v29 }
  0x36   :  { %186 = vmatmul.bf16.vlgmr.msra.gmra.mxu0 %v109_v14 }
  0x38   :  { %433 = vmatpush.bf16.msra.mxu3 %v613_v43 }
  0x39   :  { %351 = vmatpush.bf16.msra.mxu2 %v604_v30 }
  0x3c   :  { %434 = vmatpush.bf16.msra.mxu3 %v612_v44 }
  0xb3   :  { %v187_v24 = vpop.f32.mrf.mxu0 }
  0xb4   :  { %v188_v25 = vadd.f32 %v628_v23, %v187_v24 }
  0xb6   :  { %v191_v26 = vmax.f32 %v188_v25, 0.0 }
  0xb8   :  { %v192_v27 = vpack.c.bf16 %v191_v26, %v191_v26 }
  0xba   :  { %269 = vmatmul.bf16.vlgmr.msra.gmra.mxu1 %v192_v27 }
  0xbb   :  { %v189_v28 = vpop.f32.mrf.mxu0 }
 0x137   :  { %v270_v38 = vpop.f32.mrf.mxu1 }
 0x138   :  { %v271_v39 = vadd.f32 %v629_v37, %v270_v38 }
 0x13a   :  { %v274_v40 = vmax.f32 %v271_v39, 0.0 }
 0x13c   :  { %v275_v41 = vpack.c.bf16 %v274_v40, %v274_v40 }
 0x13e   :  { %352 = vmatmul.bf16.vlgmr.msra.gmra.mxu2 %v275_v41 }
 0x13f   :  { %v272_v42 = vpop.f32.mrf.mxu1 }
 0x1c1   :  { %v353_v46 = vpop.f32.mrf.mxu2 }
 0x1c2   :  { %v354_v47 = vadd.f32 %v630_v45, %v353_v46 }
 0x1c4   :  { %v357_v48 = vmax.f32 %v354_v47, 0.0 }
 0x1c6   :  { %v358_v49 = vpack.c.bf16 %v357_v48, %v357_v48 }
 0x1c8   :  { %435 = vmatmul.bf16.vlgmr.msra.gmra.mxu3 %v358_v49 }
 0x1c9   :  { %v355_v50 = vpop.f32.mrf.mxu2 }
 0x24b   :  { %v436_v52 = vpop.f32.mrf.mxu3 }
 0x24c   :  { %v437_v53 = vadd.f32 %v631_v51, %v436_v52 }
 0x24e   :  { %440 = vst [vmem:[#allocation11] sm:$0xff] %v437_v53 }
 0x24f   :  { %451 = dma.vmem_to_hbm [thread:$0]  %s447_s17, 128, %s449_s20, [#allocation4]  }
 0x253   :  { %v438_v54 = vpop.f32.mrf.mxu3 }
 0x254   :  { %782 = dma.done.wait [#allocation4], 128  }
 0x255   :  { %783 = vsyncadd [#allocation4], 4294967168 }
 0x256   :  { %456 = vsyncpa [#allocation3], 1 }
 0x257   :  { %457 = vsyncpa [#allocation6], 1 }
 0x258   :  { %458 = vsyncpa [#allocation9], 1 }
 0x259   :  { %459 = vsyncpa [#allocation4], 1 }

</bundles_post_ra>
